<compile_context>
chip_gen: v7x
topology: tpu7x:2x2x1
jax: 0.10.0
libtpu: 0.0.40
codegen_flags: <defaults>
</compile_context>

<pallas_src>
import jax
import jax.numpy as jnp
from jax.experimental import pallas as pl
from jax.experimental.pallas import tpu as pltpu


def _round_up(x, m):
    return ((x + m - 1) // m) * m


def _mlp_kernel(x_ref,
                w1_ref, b1_ref,
                w2_ref, b2_ref,
                w3_ref, b3_ref,
                w4_ref, b4_ref,
                o_ref):
    """One row-tile of the 4-layer MLP head.

    x_ref:   (TILE, D)        f32   (cast to bf16 in-kernel for the MXU)
    wN_ref:  bf16 weights (eval-mode BN affines pre-folded)
    bN_ref:  f32 biases (1, N)
    o_ref:   (TILE, OUT_PAD)  bf16  (lane-padded to 128 -> unmasked stores)
    """
    x = x_ref[...].astype(jnp.bfloat16)

    # LinearBlock 1: Linear -> ReLU (BN folded into layer 2, dropout = identity)
    h = jnp.dot(x, w1_ref[...], preferred_element_type=jnp.float32) + b1_ref[...]
    h = jnp.maximum(h, 0.0).astype(jnp.bfloat16)

    # LinearBlock 2
    h = jnp.dot(h, w2_ref[...], preferred_element_type=jnp.float32) + b2_ref[...]
    h = jnp.maximum(h, 0.0).astype(jnp.bfloat16)

    # LinearBlock 3
    h = jnp.dot(h, w3_ref[...], preferred_element_type=jnp.float32) + b3_ref[...]
    h = jnp.maximum(h, 0.0).astype(jnp.bfloat16)

    # Final Linear (64 -> OUT_PAD; columns >= OUT hold zero-padded weights)
    out = jnp.dot(h, w4_ref[...], preferred_element_type=jnp.float32) + b4_ref[...]

    o_ref[...] = out.astype(o_ref.dtype)


def _fold_params(params, out_pad):
    """Fold eval-mode BN affines into the next layer's weights/bias (exact, f32)."""
    f = {}
    f["w1"] = params["w1"]
    f["b1"] = params["b1"]
    # layer i's post-ReLU affine (s_{i-1}, t_{i-1}) folds into layer i
    for i in (2, 3, 4):
        s = params[f"s{i-1}"]            # (1, d_in_of_layer_i)
        t = params[f"t{i-1}"]
        w = params[f"w{i}"]              # (d_in, d_out)
        b = params[f"b{i}"]              # (1, d_out)
        f[f"w{i}"] = s.reshape(-1, 1) * w
        f[f"b{i}"] = t @ w + b
    # Lane-pad the final layer so the kernel output is a dense 128-wide slab.
    out_dim = f["w4"].shape[1]
    if out_pad > out_dim:
        f["w4"] = jnp.pad(f["w4"], ((0, 0), (0, out_pad - out_dim)))
        f["b4"] = jnp.pad(f["b4"], ((0, 0), (0, out_pad - out_dim)))
    return f


def libri_phone_net_forward(batch_padded_sequences, sequences_len, params,
                            *, tile_rows=512, compute_dtype=jnp.bfloat16):
    """batch_padded_sequences: (B, T, D) f32; sequences_len: (B,) int32."""
    x = batch_padded_sequences
    B, T, D = x.shape
    OUT = params["w4"].shape[1]
    OUT_PAD = _round_up(OUT, 128)

    folded = _fold_params(params, OUT_PAD)

    total = B * T
    # Row tile: big tiles amortize the per-grid-step overhead (mem-bound kernel
    # reaches ~85% of the HBM roofline at 512-1024-row tiles). Multiples of 16
    # keep bf16 output sublane packing and the (8,128) block rule happy; the
    # ceil(total/2) cap guarantees >= 2 grid steps for the 2 TCs on v7x.
    tile = min(tile_rows, _round_up(total, 16))
    tile = max(16, min(tile, _round_up(pl.cdiv(total, 2), 16)))
    grid = (pl.cdiv(total, tile),)

    xf = x.reshape(total, D)  # f32, read directly by the kernel (cast in-body)

    weights = [folded["w1"].astype(compute_dtype),
               folded["w2"].astype(compute_dtype),
               folded["w3"].astype(compute_dtype),
               folded["w4"].astype(compute_dtype)]
    biases = [folded["b1"], folded["b2"], folded["b3"], folded["b4"]]  # f32

    param_list = [weights[0], biases[0],
                  weights[1], biases[1],
                  weights[2], biases[2],
                  weights[3], biases[3]]

    # Advisory cost estimate for XLA scheduling around the custom call.
    h1, h2, h3 = weights[0].shape[1], weights[1].shape[1], weights[2].shape[1]
    n_rows = grid[0] * tile
    flops = 2 * n_rows * (D * h1 + h1 * h2 + h2 * h3 + h3 * OUT_PAD)
    bytes_accessed = (
        total * D * 4                                # f32 input rows
        + total * OUT_PAD * 2                        # bf16 output rows
        + sum(int(p.size) * p.dtype.itemsize for p in param_list)
    )
    cost = pl.CostEstimate(flops=int(flops), transcendentals=0,
                           bytes_accessed=int(bytes_accessed))

    out = pl.pallas_call(
        _mlp_kernel,
        out_shape=jax.ShapeDtypeStruct((total, OUT_PAD), compute_dtype),
        grid=grid,
        in_specs=[pl.BlockSpec((tile, D), lambda i: (i, 0))]
                 + [pl.BlockSpec(p.shape, lambda i: (0, 0)) for p in param_list],
        out_specs=pl.BlockSpec((tile, OUT_PAD), lambda i: (i, 0)),
        compiler_params=pltpu.CompilerParams(
            dimension_semantics=("parallel",)),
        cost_estimate=cost,
    )(xf, *param_list)

    # Slice to the real output width, cast back to f32, and apply the
    # sequence-length zero-padding (== torch.cat([pred, zeros])). XLA fuses the
    # slice + cast + where into a single pass over the bf16 kernel output.
    out = out[:, :OUT].astype(jnp.float32).reshape(B, T, OUT)
    valid = jnp.arange(T, dtype=jnp.int32)[None, :, None] < sequences_len[:, None, None]
    return jnp.where(valid, out, 0.0)


def _init_params(key, phone_dim, output_dim=41):
    """Deterministic synthetic parameters (shapes from LibriPhoneNet.__init__)."""
    dims = [phone_dim, 256, 128, 64]
    params = {}
    keys = jax.random.split(key, 20)
    ki = 0
    eps = 1e-5
    for idx, (din, dout) in enumerate(zip(dims[:-1], dims[1:]), start=1):
        w = jax.random.normal(keys[ki], (din, dout), jnp.float32) * 0.05; ki += 1
        b = jax.random.normal(keys[ki], (1, dout), jnp.float32) * 0.05; ki += 1
        gamma = 1.0 + 0.1 * jax.random.normal(keys[ki], (1, dout), jnp.float32); ki += 1
        beta = 0.1 * jax.random.normal(keys[ki], (1, dout), jnp.float32); ki += 1
        run_mean = 0.05 * jax.random.normal(keys[ki], (1, dout), jnp.float32); ki += 1
        run_var = 1.0 + 0.1 * jax.random.uniform(keys[ki], (1, dout), jnp.float32); ki += 1
        # Eval-mode BatchNorm1d as per-channel affine: y = x*s + t
        s = gamma / jnp.sqrt(run_var + eps)
        t = beta - run_mean * s
        params[f"w{idx}"] = w
        params[f"b{idx}"] = b
        params[f"s{idx}"] = s
        params[f"t{idx}"] = t
    params["w4"] = jax.random.normal(keys[ki], (dims[-1], output_dim), jnp.float32) * 0.05
    params["b4"] = jax.random.normal(keys[ki + 1], (1, output_dim), jnp.float32) * 0.05
    return params


def _reference_forward(x, sequences_len, params):
    """Pure-JAX f32 reference of the eval-mode forward (unfolded BN affines)."""
    h = x
    for idx in (1, 2, 3):
        h = jnp.maximum(h @ params[f"w{idx}"] + params[f"b{idx}"], 0.0)
        h = h * params[f"s{idx}"] + params[f"t{idx}"]
    out = h @ params["w4"] + params["b4"]
    T = x.shape[1]
    valid = jnp.arange(T)[None, :, None] < sequences_len[:, None, None]
    return jnp.where(valid, out, 0.0)


if __name__ == "__main__":
    B, T, PHONE_DIM, OUT = 2, 16, 39, 41

    key = jax.random.PRNGKey(0)
    k_x, k_p = jax.random.split(key)
    x = jax.random.normal(k_x, (B, T, PHONE_DIM), jnp.float32)
    sequences_len = jnp.array([13, 7], dtype=jnp.int32)   # per-sequence valid lengths
    params = _init_params(k_p, PHONE_DIM, OUT)

    out = libri_phone_net_forward(x, sequences_len, params)
    out = jax.block_until_ready(out)

    ref = _reference_forward(x, sequences_len, params)
    assert out.shape == (B, T, OUT)
    # bf16 inputs/weights/output with f32 MXU accumulation -> loose tolerance
    # vs the f32 reference.
    assert jnp.allclose(out, ref, atol=2e-2, rtol=2e-2)

    print("KERNEL_OK")
</pallas_src>

<mosaic_0001>
module attributes {stable_mosaic.version = 11 : i64} {
  func.func @_mlp_kernel(%arg0: i32, %arg1: memref<16x39xf32, #tpu.memory_space<vmem>>, %arg2: memref<39x256xbf16, #tpu.memory_space<vmem>>, %arg3: memref<1x256xf32, #tpu.memory_space<vmem>>, %arg4: memref<256x128xbf16, #tpu.memory_space<vmem>>, %arg5: memref<1x128xf32, #tpu.memory_space<vmem>>, %arg6: memref<128x64xbf16, #tpu.memory_space<vmem>>, %arg7: memref<1x64xf32, #tpu.memory_space<vmem>>, %arg8: memref<64x128xbf16, #tpu.memory_space<vmem>>, %arg9: memref<1x128xf32, #tpu.memory_space<vmem>>, %arg10: memref<16x128xbf16, #tpu.memory_space<vmem>>) attributes {dimension_semantics = [#tpu.dimension_semantics<parallel>], iteration_bounds = array<i64: 2>, scalar_prefetch = 0 : i64, scratch_operands = 0 : i64, tpu.core_type = #tpu.core_type<tc>, window_params = [{transform_indices = @transform_0, window_bounds = array<i64: 16, 39>}, {pipeline_mode = #tpu.pipeline_mode<synchronous>, transform_indices = @transform_1, window_bounds = array<i64: 39, 256>}, {pipeline_mode = #tpu.pipeline_mode<synchronous>, transform_indices = @transform_2, window_bounds = array<i64: 1, 256>}, {pipeline_mode = #tpu.pipeline_mode<synchronous>, transform_indices = @transform_3, window_bounds = array<i64: 256, 128>}, {pipeline_mode = #tpu.pipeline_mode<synchronous>, transform_indices = @transform_4, window_bounds = array<i64: 1, 128>}, {pipeline_mode = #tpu.pipeline_mode<synchronous>, transform_indices = @transform_5, window_bounds = array<i64: 128, 64>}, {pipeline_mode = #tpu.pipeline_mode<synchronous>, transform_indices = @transform_6, window_bounds = array<i64: 1, 64>}, {pipeline_mode = #tpu.pipeline_mode<synchronous>, transform_indices = @transform_7, window_bounds = array<i64: 64, 128>}, {pipeline_mode = #tpu.pipeline_mode<synchronous>, transform_indices = @transform_8, window_bounds = array<i64: 1, 128>}, {transform_indices = @transform_9, window_bounds = array<i64: 16, 128>}]} {
    %c0 = arith.constant 0 : index
    %c0_0 = arith.constant 0 : index
    %0 = vector.load %arg1[%c0, %c0_0] : memref<16x39xf32, #tpu.memory_space<vmem>>, vector<16x39xf32>
    %1 = arith.truncf %0 : vector<16x39xf32> to vector<16x39xbf16>
    %c0_1 = arith.constant 0 : index
    %c0_2 = arith.constant 0 : index
    %2 = vector.load %arg2[%c0_1, %c0_2] : memref<39x256xbf16, #tpu.memory_space<vmem>>, vector<39x256xbf16>
    %cst = arith.constant dense<0.000000e+00> : vector<16x256xf32>
    %3 = tpu.matmul %1, %2, %cst {dimension_numbers = #tpu.dot_dimension_numbers<[1], [0], [0], [1], [0, 0, 1, 1], [], []>} : vector<16x39xbf16>, vector<39x256xbf16>, vector<16x256xf32> -> vector<16x256xf32>
    %c0_3 = arith.constant 0 : index
    %c0_4 = arith.constant 0 : index
    %4 = vector.load %arg3[%c0_3, %c0_4] : memref<1x256xf32, #tpu.memory_space<vmem>>, vector<1x256xf32>
    %5 = vector.broadcast %4 : vector<1x256xf32> to vector<16x256xf32>
    %6 = arith.addf %3, %5 : vector<16x256xf32>
    %cst_5 = arith.constant 0.000000e+00 : f32
    %7 = vector.broadcast %cst_5 : f32 to vector<16x256xf32>
    %8 = arith.maximumf %6, %7 : vector<16x256xf32>
    %9 = arith.truncf %8 : vector<16x256xf32> to vector<16x256xbf16>
    %c0_6 = arith.constant 0 : index
    %c0_7 = arith.constant 0 : index
    %10 = vector.load %arg4[%c0_6, %c0_7] : memref<256x128xbf16, #tpu.memory_space<vmem>>, vector<256x128xbf16>
    %cst_8 = arith.constant dense<0.000000e+00> : vector<16x128xf32>
    %11 = tpu.matmul %9, %10, %cst_8 {dimension_numbers = #tpu.dot_dimension_numbers<[1], [0], [0], [1], [0, 0, 1, 1], [], []>} : vector<16x256xbf16>, vector<256x128xbf16>, vector<16x128xf32> -> vector<16x128xf32>
    %c0_9 = arith.constant 0 : index
    %c0_10 = arith.constant 0 : index
    %12 = vector.load %arg5[%c0_9, %c0_10] : memref<1x128xf32, #tpu.memory_space<vmem>>, vector<1x128xf32>
    %13 = vector.broadcast %12 : vector<1x128xf32> to vector<16x128xf32>
    %14 = arith.addf %11, %13 : vector<16x128xf32>
    %cst_11 = arith.constant 0.000000e+00 : f32
    %15 = vector.broadcast %cst_11 : f32 to vector<16x128xf32>
    %16 = arith.maximumf %14, %15 : vector<16x128xf32>
    %17 = arith.truncf %16 : vector<16x128xf32> to vector<16x128xbf16>
    %c0_12 = arith.constant 0 : index
    %c0_13 = arith.constant 0 : index
    %18 = vector.load %arg6[%c0_12, %c0_13] : memref<128x64xbf16, #tpu.memory_space<vmem>>, vector<128x64xbf16>
    %cst_14 = arith.constant dense<0.000000e+00> : vector<16x64xf32>
    %19 = tpu.matmul %17, %18, %cst_14 {dimension_numbers = #tpu.dot_dimension_numbers<[1], [0], [0], [1], [0, 0, 1, 1], [], []>} : vector<16x128xbf16>, vector<128x64xbf16>, vector<16x64xf32> -> vector<16x64xf32>
    %c0_15 = arith.constant 0 : index
    %c0_16 = arith.constant 0 : index
    %20 = vector.load %arg7[%c0_15, %c0_16] : memref<1x64xf32, #tpu.memory_space<vmem>>, vector<1x64xf32>
    %21 = vector.broadcast %20 : vector<1x64xf32> to vector<16x64xf32>
    %22 = arith.addf %19, %21 : vector<16x64xf32>
    %cst_17 = arith.constant 0.000000e+00 : f32
    %23 = vector.broadcast %cst_17 : f32 to vector<16x64xf32>
    %24 = arith.maximumf %22, %23 : vector<16x64xf32>
    %25 = arith.truncf %24 : vector<16x64xf32> to vector<16x64xbf16>
    %c0_18 = arith.constant 0 : index
    %c0_19 = arith.constant 0 : index
    %26 = vector.load %arg8[%c0_18, %c0_19] : memref<64x128xbf16, #tpu.memory_space<vmem>>, vector<64x128xbf16>
    %cst_20 = arith.constant dense<0.000000e+00> : vector<16x128xf32>
    %27 = tpu.matmul %25, %26, %cst_20 {dimension_numbers = #tpu.dot_dimension_numbers<[1], [0], [0], [1], [0, 0, 1, 1], [], []>} : vector<16x64xbf16>, vector<64x128xbf16>, vector<16x128xf32> -> vector<16x128xf32>
    %c0_21 = arith.constant 0 : index
    %c0_22 = arith.constant 0 : index
    %28 = vector.load %arg9[%c0_21, %c0_22] : memref<1x128xf32, #tpu.memory_space<vmem>>, vector<1x128xf32>
    %29 = vector.broadcast %28 : vector<1x128xf32> to vector<16x128xf32>
    %30 = arith.addf %27, %29 : vector<16x128xf32>
    %31 = arith.truncf %30 : vector<16x128xf32> to vector<16x128xbf16>
    %c0_23 = arith.constant 0 : index
    %c0_24 = arith.constant 0 : index
    %32 = vector.load %arg10[%c0_23, %c0_24] : memref<16x128xbf16, #tpu.memory_space<vmem>>, vector<16x128xbf16>
    tpu.vector_store %arg10[%c0_23, %c0_24], %31 {strides = array<i32>} : memref<16x128xbf16, #tpu.memory_space<vmem>>, vector<16x128xbf16>,
    return
  }
  func.func @transform_0(%arg0: i32) -> (i32, i32) {
    %c0_i32 = arith.constant 0 : i32
    %c0_i32_0 = arith.constant 0 : i32
    return %arg0, %c0_i32 : i32, i32
  }
  func.func @transform_1(%arg0: i32) -> (i32, i32) {
    %c0_i32 = arith.constant 0 : i32
    %c0_i32_0 = arith.constant 0 : i32
    %c0_i32_1 = arith.constant 0 : i32
    return %c0_i32, %c0_i32_0 : i32, i32
  }
  func.func @transform_2(%arg0: i32) -> (i32, i32) {
    %c0_i32 = arith.constant 0 : i32
    %c0_i32_0 = arith.constant 0 : i32
    %c0_i32_1 = arith.constant 0 : i32
    return %c0_i32, %c0_i32_0 : i32, i32
  }
  func.func @transform_3(%arg0: i32) -> (i32, i32) {
    %c0_i32 = arith.constant 0 : i32
    %c0_i32_0 = arith.constant 0 : i32
    %c0_i32_1 = arith.constant 0 : i32
    return %c0_i32, %c0_i32_0 : i32, i32
  }
  func.func @transform_4(%arg0: i32) -> (i32, i32) {
    %c0_i32 = arith.constant 0 : i32
    %c0_i32_0 = arith.constant 0 : i32
    %c0_i32_1 = arith.constant 0 : i32
    return %c0_i32, %c0_i32_0 : i32, i32
  }
  func.func @transform_5(%arg0: i32) -> (i32, i32) {
    %c0_i32 = arith.constant 0 : i32
    %c0_i32_0 = arith.constant 0 : i32
    %c0_i32_1 = arith.constant 0 : i32
    return %c0_i32, %c0_i32_0 : i32, i32
  }
  func.func @transform_6(%arg0: i32) -> (i32, i32) {
    %c0_i32 = arith.constant 0 : i32
    %c0_i32_0 = arith.constant 0 : i32
    %c0_i32_1 = arith.constant 0 : i32
    return %c0_i32, %c0_i32_0 : i32, i32
  }
  func.func @transform_7(%arg0: i32) -> (i32, i32) {
    %c0_i32 = arith.constant 0 : i32
    %c0_i32_0 = arith.constant 0 : i32
    %c0_i32_1 = arith.constant 0 : i32
    return %c0_i32, %c0_i32_0 : i32, i32
  }
  func.func @transform_8(%arg0: i32) -> (i32, i32) {
    %c0_i32 = arith.constant 0 : i32
    %c0_i32_0 = arith.constant 0 : i32
    %c0_i32_1 = arith.constant 0 : i32
    return %c0_i32, %c0_i32_0 : i32, i32
  }
  func.func @transform_9(%arg0: i32) -> (i32, i32) {
    %c0_i32 = arith.constant 0 : i32
    %c0_i32_0 = arith.constant 0 : i32
    return %arg0, %c0_i32 : i32, i32
  }
}

</mosaic_0001>

<bundles_post_ra>
// kernel: tpu_custom_call.1
= control target key start
LH: loop header
LB: loop body
LE: loop exit
PB: predicated region body
PF: predicated region fallthrough
CT: control target
= control target key end

     0   :  { %14 = vsyncpa [#allocation3], 0  ;;  %s1529_s0 = inlined_call_operand.vmem [shape: f32[32,39], index: 0, kind: input, shape index: {}]   ;;  %s1530_s1 = inlined_call_operand.vmem [shape: bf16[39,256], index: 1, kind: input, shape index: {}]   ;;  %s1531_s2 = inlined_call_operand.vmem [shape: f32[1,256], index: 2, kind: input, shape index: {}]   ;;  %s1532_s3 = inlined_call_operand.hbm [shape: bf16[256,128], index: 3, kind: input, shape index: {}]   ;;  %s1533_s4 = inlined_call_operand.vmem [shape: f32[1,128], index: 4, kind: input, shape index: {}]   ;;  %s1534_s5 = inlined_call_operand.vmem [shape: bf16[128,64], index: 5, kind: input, shape index: {}]   ;;  %s1535_s6 = inlined_call_operand.vmem [shape: f32[1,64], index: 6, kind: input, shape index: {}]   ;;  %s1536_s7 = inlined_call_operand.vmem [shape: bf16[64,128], index: 7, kind: input, shape index: {}]   ;;  %s1537_s8 = inlined_call_operand.vmem [shape: f32[1,128], index: 8, kind: input, shape index: {}]   ;;  %s1538_s9 = inlined_call_operand.hbm [shape: bf16[32,128], index: 9, kind: output, shape index: {}]  }
   0x1   :  { %15 = vsyncpa [#allocation4], 0 }
   0x2   :  { %17 = vsyncpa [#allocation4 + $0x1], 0  ;;  %s1315_s30 = smov 0   ;;  %s1317_s10 = smov 0  }
   0x3   :  { %s1319_s11 = smov 0   ;;  %s1321_s12 = smov 0  }
   0x4 LB: > { %s1336_s13 = sadd.s32 4294967295, %s1253_s12   ;;  %s934_s14 = sadd.s32 4294967294, %s1253_s12   ;;  %s1253_s12 = sphi %s1321_s12, %s1554_s12   ;;  %s1249_s11 = sphi %s1319_s11, %s1553_s11   ;;  %s1245_s10 = sphi %s1317_s10, %s1552_s10   ;;  %s1241_s30 = sphi %s1315_s30, %s1551_s30  }
   0x5   : > { %s1340_s15 = sadd.s32 1, %s1253_s12   ;;  %s224_s16 = sadd.s32 1, %s1249_s11 }
   0x6   : > { %s221_s17 = ssub.s32 %s1253_s12, %s1340_s15  ;;  %p234_p0 = scmp.ne.s32.totalorder %s1249_s11, %s1245_s10 }
   0x7   : > { %p222_p1 = scmp.eq.s32.totalorder %s221_s17, 0  ;;  %p235_p2 = scmp.eq.s32.totalorder %s1336_s13, 1 }
   0x8   : > { %p240_p3 = scmp.ne.s32.totalorder %s1245_s10, %s1241_s30  ;;  %p241_p4 = scmp.eq.s32.totalorder %s934_s14, 1 }
   0x9   : > { %s1351_s18 = scalar_select %p222_p1, %s1249_s11, %s224_s16  }
   0xa   : > { %p1353_p5 = por %p235_p2, %p234_p0  ;;  %p1357_p6 = por %p241_p4, %p240_p3 }
   0xb   : > { %p935_p7 = scmp.ge.s32.totalorder %s1253_s12, 1  ;;  %p248_p8 = scmp.lt.s32.totalorder %s1253_s12, 3 }
   0xc   : > { %s1542_s19 = scalar_select %p1353_p5, 1, 0 }
   0xd   : > { %s1543_s20 = scalar_select %p1357_p6, 1, 0 }
   0xe   : > { %p1539_p9 = scmp.eq.s32.totalorder %s1336_s13, 0  ;;  %p1364_p10 = pnand %p935_p7, %p248_p8 }
   0xf   : > { %s1255_s22 = smov [#allocation2]   ;;  %s1159_s27 = scalar_lea.hbm %s1532_s3, 2048 }
  0x10   : > { %s1544_s21 = scalar_select %p1364_p10, 1, 0 }
  0x11   : > { %s266_s23 = sshll.u32 %s1255_s22, 4  ;;  %p1071_p11 = pneg %p1364_p10  ;;  %s267_s23 = int_to_ptr.vmem [resolvable:$true] %s266_s23 }
  0x12   : > { %p1160_p13 = scmp.ne.s32.totalorder %s1532_s3, %s1159_s27  ;;  %p1166_p3 = scmp.lt.u32.totalorder %s1159_s27, %s1532_s3 }
  0x13   : > { %p1372_p12 = pnand %p1539_p9, %p1071_p11 }
  0x15   : > { %p1161_p0 = pneg %p1372_p12 }
  0x17   : > { %p1162_p1 = pnand %p1161_p0, %p1160_p13 }
  0x19   : > { %p1163_p2 = pneg %p1162_p1 }
  0x1b   : > { %p1168_p4 = pnand %p1166_p3, %p1163_p2 }
  0x1d   : > { %1171 = shalt.err (!%p1168_p4)
}
  0x1e   : > { %s1172_s17 = scalar_lea.vmem %s267_s23, 2048  ;;  %p1180_p9 = scmp.lt.s32.totalorder %s267_s23, %s267_s23 }
  0x1f   : > { %p1173_p7 = scmp.ne.s32.totalorder %s267_s23, %s1172_s17  ;;  %p1181_p6 = scmp.lt.s32.totalorder %s1172_s17, %s1172_s17 }
  0x21   : > { %p1175_p8 = pnand %p1173_p7, %p1161_p0  ;;  %p1182_p5 = por %p1181_p6, %p1180_p9 }
  0x23   : > { %p1176_p11 = pneg %p1175_p8 }
  0x25   : > { %p1183_p10 = pnand %p1182_p5, %p1176_p11 }
  0x27   : > { %1186 = shalt.err (!%p1183_p10)
}
  0x28   : > { %s1256_s22 = smov 64   ;;  %s1257_s25 = smov 4  }
  0x29   : > { %1074 = dma.hbm_to_vmem [thread:$0]  (!%p1372_p12), %s1532_s3, 2048, %s267_s23, [#allocation3], %s1256_s22, %s1256_s22, %s1257_s25  }
  0x2a   : > { %p1546_p13 = scmp.ne.s32.totalorder %s1544_s21, 0 }
  0x2b   : > { %p1547_p1 = scmp.eq.s32.totalorder (!%p1546_p13), %s1336_s13, 0 }
  0x2c   : > { %306 = sbr.rel (%p1546_p13) target bundleno = 964 (0x3c4), region = 56 }
  0x33   : > { %1232 = dma.done.wait (%p1547_p1), [#allocation3], 2048   ;;  %p1548_p0 = pmov %p1547_p1 }
  0x34   : > { %v1258_v0 = vmov 0   ;;  %s941_s27 = sshll.u32 %s1336_s13, 1  ;;  %vm399_vm0 = vcmask 1042432   ;;  %vm400_vm1 = vcmask 1043456   ;;  %v1259_v1 = vmov 65535   ;;  %v357_v6 = vld [vmem:[%s1530_s1 + $0x20] sm:$0xff] }
  0x35   : > { %1234 = vsyncadd (%p1548_p0), [#allocation3], 4294965248  ;;  %441 = vmatprep.mubr.bf16.mxu0 %v1258_v0  ;;  %p343_p5 = scmp.lt.s32.totalorder %s941_s27, 3  ;;  %v401_v2 = vsel %vm399_vm0, 4294967295, %v1259_v1  ;;  %v1123_v3 = vld [vmem:[%s1530_s1 + $0x4] ss:$8 sps:$4 sm:$0xff]   ;;  %v948_v9 = vcombine.high %v357_v6, %v357_v6  ;;  %v947_v10 = vcombine.low %v357_v6, %v357_v6  ;;  %v360_v38 = vlaneseq }
  0x36   : > { %v1125_v4 = vld [vmem:[%s1530_s1] ss:$8 sps:$4 sm:$0xff]   ;;  %409 = vmatprep.subr.bf16.mxu0 %v1123_v3  ;;  %v1126_v5 = vld [vmem:[%s1530_s1 + $0x14] ss:$8 sps:$4 sm:$0xff]   ;;  %v402_v7 = vsel %vm400_vm1, %v401_v2, 0  ;;  %vm395_vm2 = vcmask 318464  }
  0x37   : > { %s1556_s27 = smov (!%p343_p5, %s941_s27), 3  ;;  %410 = vmatpush1.bf16.msra.mxu0 %v1125_v4  ;;  %v1128_v8 = vld [vmem:[%s1530_s1 + $0x10] ss:$8 sps:$4 sm:$0xff]   ;;  %v1131_v11 = vld [vmem:[#allocation2 + $0x40] sm:$0xff]   ;;  %v407_v12 = vand.u32 %v948_v9, %v402_v7  ;;  %v1133_v16 = vld [vmem:[#allocation2 + $0x48] sm:$0xff]   ;;  %v404_v17 = vand.u32 %v947_v10, %v402_v7  ;;  %v1260_v33 = vmov 0.0  }
  0x38   : > { %s942_s23 = sshll.u32 %s1556_s27, 3  ;;  %411 = vmatprep.subr.bf16.mxu0 %v1126_v5  ;;  %v1132_v15 = vld [vmem:[#allocation2] sm:$0xff]   ;;  %997 = vmatprep.subr.bf16.mxu1 %v1131_v11  ;;  %v1134_v18 = vld [vmem:[#allocation2 + $0x8] sm:$0xff]   ;;  %v1135_v19 = vld [vmem:[#allocation2 + $0x50] sm:$0xff]   ;;  %v361_v39 = vshrl.u32 %v360_v38, 7  ;;  %vm1261_vm3 = vmmov 0  }
  0x39   : > { %s346_s27 = scalar_lea.vmem %s1529_s0, %s942_s23  ;;  %998 = vmatpush3.bf16.msra.mxu1 %v1132_v15  ;;  %v1136_v21 = vld [vmem:[#allocation2 + $0x10] sm:$0xff]   ;;  %v1137_v22 = vld [vmem:[#allocation2 + $0x58] sm:$0xff]   ;;  %v1139_v24 = vld [vmem:[#allocation2 + $0x60] sm:$0xff]   ;;  %vm791_vm4 = vcmask 523264   ;;  %s339_s25 = sand.u32 1, %s1245_s10  }
  0x3a   : > { %v350_v13 = vld [vmem:[%s346_s27] sm:$0xff]  ;;  %v351_v14 = vld [vmem:[%s346_s27 + $0x8] sm:$0xff]  ;;  %999 = vmatprep.subr.bf16.mxu1 %v1133_v16  ;;  %v1138_v23 = vld [vmem:[#allocation2 + $0x18] sm:$0xff]   ;;  %v362_v40 = vsub.s32 0, %v361_v39  ;;  %v366_v42 = vsub.s32 1, %v361_v39  ;;  %s940_s26 = sshll.u32 %s339_s25, 3 }
  0x3b   : > { %412 = vmatpush1.bf16.msra.mxu0 %v1128_v8  ;;  %v352_v20 = vpack.c.bf16 %v351_v14, %v350_v13  ;;  %v1140_v25 = vld [vmem:[#allocation2 + $0x20] sm:$0xff]   ;;  %v1141_v26 = vld [vmem:[#allocation2 + $0x68] sm:$0xff]   ;;  %v1143_v28 = vld [vmem:[#allocation2 + $0x70] sm:$0xff]   ;;  %s341_s24 = scalar_lea.vmem [#allocation5], %s940_s26  ;;  %s991_s23 = sshll.u32 %s1336_s13, 7 }
  0x3c   : > { %413 = vmatprep.subr.bf16.mxu0 %v407_v12  ;;  %v1142_v27 = vld [vmem:[#allocation2 + $0x28] sm:$0xff]   ;;  %v1144_v29 = vld [vmem:[#allocation2 + $0x30] sm:$0xff]   ;;  %v1145_v30 = vld [vmem:[#allocation2 + $0x78] sm:$0xff]   ;;  %s860_s21 = sshll.u32 %s341_s24, 4  ;;  %s1486_s16 = scalar_lea.hbm %s1538_s9, %s991_s23  ;;  %s1481_s21 = int_to_ptr.vmem [resolvable:$true] %s860_s21 }
  0x3d   : > { %1000 = vmatpush3.bf16.msra.mxu1 %v1134_v18  ;;  %v1146_v31 = vld [vmem:[#allocation2 + $0x38] sm:$0xff]   ;;  %v1147_v32 = vld [vmem:[%s1534_s5] sm:$0xff]   ;;  %v1148_v34 = vld [vmem:[%s1534_s5 + $0x8] sm:$0xff]   ;;  %s1488_s17 = scalar_lea.sflag [#allocation4], %s339_s25  ;;  %s1187_s22 = scalar_lea.vmem %s1481_s21, 128 }
  0x3e   : > { %1001 = vmatprep.subr.bf16.mxu1 %v1135_v19  ;;  %v1149_v35 = vld [vmem:[%s1534_s5 + $0x10] sm:$0xff]   ;;  %v1150_v36 = vld [vmem:[%s1534_s5 + $0x18] sm:$0xff]   ;;  %v1151_v37 = vld [vmem:[%s1534_s5 + $0x20] sm:$0xff]   ;;  %p1188_p6 = scmp.ne.s32.totalorder %s1481_s21, %s1187_s22  ;;  %p1549_p9 = scmp.ne.s32.totalorder %s1542_s19, 0 }
  0x3f   : > { %414 = vmatpush1.bf16.msra.mxu0 %v404_v17  ;;  %v358_v41 = vld [vmem:[%s1531_s2] sm:$0x3]  ;;  %v1152_v59 = vld [vmem:[%s1534_s5 + $0x28] sm:$0xff]   ;;  %v1153_v60 = vld [vmem:[%s1534_s5 + $0x30] sm:$0xff]   ;;  %s1262_s13 = smov [#allocation5]  }
  0x40   : > { %1033 = vmatprep.subr.bf16.mxu0 %v1260_v33  ;;  %v363_v43 = vrot.slane %v358_v41, %v362_v40  ;;  %v367_v44 = vrot.slane %v358_v41, %v366_v42  ;;  %v1154_v61 = vld [vmem:[%s1534_s5 + $0x38] sm:$0xff]   ;;  %v1155_v62 = vld [vmem:[%s1536_s7] sm:$0xff]   ;;  %v1156_v63 = vld [vmem:[%s1536_s7 + $0x8] sm:$0xff]   ;;  %p1189_p10 = pnand %p1188_p6, %p1549_p9  ;;  %s1191_s26 = sshll.u32 %s1262_s13, 4  ;;  %s1192_s26 = int_to_ptr.vmem [resolvable:$false] %s1191_s26 }
  0x41   : > { %1002 = vmatpush3.bf16.msra.mxu1 %v1136_v21  ;;  %v950_v1 = vld [vmem:[%s1533_s4] ss:$0 sm:$0xff]  ;;  %v1157_v12 = vld [vmem:[%s1536_s7 + $0x10] sm:$0xff]   ;;  %v1158_v13 = vld [vmem:[%s1536_s7 + $0x18] sm:$0xff]   ;;  %s1193_s28 = scalar_lea.vmem %s1192_s26, 256  ;;  %p1194_p2 = scmp.lt.s32.totalorder %s1481_s21, %s1192_s26 }
  0x42   : > { %949 = vmatmul.mubr.msk.bf16.vlgmr.msra.gmra.mrb[0].mxu0 %vm395_vm2, %v352_v20  ;;  %1003 = vmatprep.subr.bf16.mxu1 %v1137_v22  ;;  %v967_v14 = vld [vmem:[%s1535_s6] ss:$0 sm:$0xff]  ;;  %p1190_p12 = pneg %p1189_p10  ;;  %p1195_p3 = scmp.lt.s32.totalorder %s1193_s28, %s1187_s22 }
  0x43   : > { %1034 = vmatpush3.bf16.msra.mxu0 %v1147_v32  ;;  %1049 = vmatprep.mubr.msk.bf16.mxu0 %vm1261_vm3, %v1260_v33 }
  0x44   : > { %1035 = vmatprep.subr.bf16.mxu0 %v1260_v33  ;;  %p1196_p4 = por %p1195_p3, %p1194_p2 }
  0x45   : > { %1004 = vmatpush3.bf16.msra.mxu1 %v1138_v23 }
  0x46   : > { %1005 = vmatprep.subr.bf16.mxu1 %v1139_v24  ;;  %v976_v24 = vld [vmem:[%s1537_s8] ss:$0 sm:$0xff]  ;;  %p1197_p7 = pnand %p1196_p4, %p1190_p12 }
  0x47   : > { %1036 = vmatpush3.bf16.msra.mxu0 %v1148_v34 }
  0x48   : > { %1037 = vmatprep.subr.bf16.mxu0 %v1260_v33 }
  0x49   : > { %1006 = vmatpush3.bf16.msra.mxu1 %v1140_v25 }
  0x4a   : > { %1007 = vmatprep.subr.bf16.mxu1 %v1141_v26 }
  0x4b   : > { %1038 = vmatpush3.bf16.msra.mxu0 %v1149_v35 }
  0x4c   : > { %1039 = vmatprep.subr.bf16.mxu0 %v1260_v33 }
  0x4d   : > { %1008 = vmatpush3.bf16.msra.mxu1 %v1142_v27 }
  0x4e   : > { %1009 = vmatprep.subr.bf16.mxu1 %v1143_v28 }
  0x4f   : > { %1040 = vmatpush3.bf16.msra.mxu0 %v1150_v36 }
  0x50   : > { %1041 = vmatprep.subr.bf16.mxu0 %v1260_v33 }
  0x51   : > { %1010 = vmatpush3.bf16.msra.mxu1 %v1144_v29 }
  0x52   : > { %1011 = vmatprep.subr.bf16.mxu1 %v1145_v30 }
  0x53   : > { %1042 = vmatpush3.bf16.msra.mxu0 %v1151_v37 }
  0x54   : > { %1043 = vmatprep.subr.bf16.mxu0 %v1260_v33 }
  0x55   : > { %1012 = vmatpush3.bf16.msra.mxu1 %v1146_v31 }
  0x56   : > { %1053 = vmatprep.subr.bf16.mxu1 %v1260_v33 }
  0x57   : > { %1044 = vmatpush3.bf16.msra.mxu0 %v1152_v59 }
  0x58   : > { %1045 = vmatprep.subr.bf16.mxu0 %v1260_v33 }
  0x5b   : > { %1046 = vmatpush3.bf16.msra.mxu0 %v1153_v60 }
  0x5c   : > { %1047 = vmatprep.subr.bf16.mxu0 %v1260_v33 }
  0x5f   : > { %1048 = vmatpush3.bf16.msra.mxu0 %v1154_v61 }
 0x115   : > { %v443_v45 = vpop.f32.mrb[0].mxu0 }
 0x116   : > { %v444_v46 = vadd.f32 %v443_v45, %v363_v43  ;;  %v445_v47 = vpop.f32.mrb[1].mxu0 }
 0x117   : > { %v446_v48 = vadd.f32 %v445_v47, %v367_v44  ;;  %v447_v49 = vpop.f32.mrb[2].mxu0 }
 0x118   : > { %v448_v50 = vadd.f32 %v447_v49, %v363_v43  ;;  %v449_v51 = vpop.f32.mrb[3].mxu0  ;;  %v452_v53 = vmax.f32 %v444_v46, 0.0 }
 0x119   : > { %v450_v52 = vadd.f32 %v449_v51, %v367_v44  ;;  %v453_v55 = vmax.f32 %v446_v48, 0.0 }
 0x11a   : > { %v454_v54 = vmax.f32 %v448_v50, 0.0 }
 0x11b   : > { %v455_v56 = vmax.f32 %v450_v52, 0.0 }
 0x11c   : > { %v456_v57 = vpack.c.bf16 %v454_v54, %v452_v53 }
 0x11d   : > { %v457_v58 = vpack.c.bf16 %v455_v56, %v453_v55 }
 0x11f   : > { %625 = vmatprep.mubr.bf16.mxu1 %v457_v58 }
 0x120   : > { %626 = vmatmul.mubr.bf16.vlgmr.msra.gmra.mrb[0].mxu1 %v456_v57 }
 0x121   : > { %1061 = vmatprep.mubr.msk.bf16.mxu1 %vm1261_vm3, %v1260_v33  ;;  %1054 = vmatpush3.bf16.msra.mxu1 %v1155_v62 }
 0x122   : > { %1055 = vmatprep.subr.bf16.mxu1 %v1260_v33 }
 0x125   : > { %1056 = vmatpush3.bf16.msra.mxu1 %v1156_v63 }
 0x126   : > { %1057 = vmatprep.subr.bf16.mxu1 %v1260_v33 }
 0x129   : > { %1058 = vmatpush3.bf16.msra.mxu1 %v1157_v12 }
 0x12a   : > { %1059 = vmatprep.subr.bf16.mxu1 %v1260_v33 }
 0x12d   : > { %1060 = vmatpush3.bf16.msra.mxu1 %v1158_v13 }
 0x1f3   : > { %v1013_v0 = vpop.f32.mrb[0].mxu1 }
 0x1f4   : > { %v1014_v2 = vpop.f32.mrb[1].mxu1 }
 0x1f5   : > { %v1015_v3 = vadd.f32 %v1014_v2, %v1013_v0  ;;  %v1016_v4 = vpop.f32.mrb[2].mxu1 }
 0x1f6   : > { %v1017_v5 = vpop.f32.mrb[3].mxu1 }
 0x1f7   : > { %v628_v6 = vadd.f32 %v1015_v3, %v950_v1  ;;  %v1018_v7 = vadd.f32 %v1017_v5, %v1016_v4 }
 0x1f9   : > { %v631_v8 = vadd.f32 %v1018_v7, %v950_v1  ;;  %v634_v9 = vmax.f32 %v628_v6, 0.0 }
 0x1fb   : > { %v635_v10 = vmax.f32 %v631_v8, 0.0 }
 0x1fd   : > { %v636_v11 = vpack.c.bf16 %v635_v10, %v634_v9 }
 0x1ff   : > { %1050 = vmatmul.mubr.bf16.vlgmr.msra.gmra.mrb[4].mxu0 %v636_v11 }
 0x2d2   : > { %v742_v15 = vpop.f32.mrb[4].mxu0 }
 0x2d3   : > { %v743_v16 = vadd.f32 %v967_v14, %v742_v15  ;;  %v1051_v17 = vpop.f32.mrb[5].mxu0 }
 0x2d4   : > { %v745_v18 = vpop.f32.mrb[6].mxu0 }
 0x2d5   : > { %v746_v19 = vadd.f32 %v967_v14, %v745_v18  ;;  %v1052_v20 = vpop.f32.mrb[7].mxu0  ;;  %v749_v21 = vmax.f32 %v743_v16, 0.0 }
 0x2d7   : > { %v750_v22 = vmax.f32 %v746_v19, 0.0 }
 0x2d9   : > { %v751_v23 = vpack.c.bf16 %v750_v22, %v749_v21 }
 0x2db   : > { %1062 = vmatmul.mubr.msk.bf16.vlgmr.msra.gmra.mrb[4].mxu1 %vm791_vm4, %v751_v23 }
 0x3ae   : > { %v829_v25 = vpop.f32.mrb[4].mxu1 }
 0x3af   : > { %v1063_v26 = vpop.f32.mrb[5].mxu1  ;;  %v830_v28 = vadd.f32 %v976_v24, %v829_v25 }
 0x3b0   : > { %v832_v27 = vpop.f32.mrb[6].mxu1 }
 0x3b1   : > { %v833_v29 = vadd.f32 %v976_v24, %v832_v27  ;;  %v1064_v30 = vpop.f32.mrb[7].mxu1 }
 0x3b3   : > { %v995_v31 = vpack.c.bf16 %v833_v29, %v830_v28 }
 0x3b5   : > { %996 = vst [vmem:[%s341_s24] sm:$0xff] %v995_v31  }
 0x3b6   : > { %1200 = shalt.err (!%p1197_p7)
}
 0x3b7   : > { %s1201_s25 = scalar_lea.hbm %s1486_s16, 128  ;;  %s1205_s23 = scalar_lea.hbm %s1538_s9, 256 }
 0x3b8   : > { %p1202_p8 = scmp.ne.s32.totalorder %s1486_s16, %s1201_s25  ;;  %p1206_p1 = scmp.lt.u32.totalorder %s1486_s16, %s1538_s9 }
 0x3b9   : > { %p1207_p0 = scmp.lt.u32.totalorder %s1205_s23, %s1201_s25  ;;  %p1209_p6 = scmp.lt.u32.totalorder %s1201_s25, %s1486_s16 }
 0x3ba   : > { %p1203_p11 = pnand %p1202_p8, %p1549_p9 }
 0x3bb   : > { %p1208_p5 = por %p1207_p0, %p1206_p1 }
 0x3bc   : > { %p1204_p13 = pneg %p1203_p11 }
 0x3bd   : > { %p1210_p10 = por %p1209_p6, %p1208_p5 }
 0x3bf   : > { %p1211_p12 = pnand %p1210_p10, %p1204_p13 }
 0x3c1   : > { %1214 = shalt.err (!%p1211_p12)
}
 0x3c2   : > { %s1263_s22 = smov 64   ;;  %s1264_s13 = smov 4  }
 0x3c3   : > { %1069 = dma.vmem_to_hbm [thread:$0]  (%p1549_p9), %s1481_s21, 128, %s1486_s16, %s1488_s17, %s1263_s22, %s1263_s22, %s1264_s13  }
 0x3c4 PF: > { %p1081_p2 = scmp.ge.s32.totalorder %s1253_s12, 2  ;;  %s875_s26 = sand.u32 1, %s1241_s30  }
 0x3c5   : > { %p1550_p3 = scmp.ne.s32.totalorder %s1543_s20, 0  ;;  %s876_s28 = scalar_lea.sflag [#allocation4], %s875_s26 }
 0x3c7   : > { %p1076_p4 = pnand %p1081_p2, %p1550_p3 }
 0x3c9   : > { %1236 = dma.done.wait (!%p1076_p4), %s876_s28, 128  }
 0x3ca   : > { %1238 = vsyncadd (!%p1076_p4), %s876_s28, 4294967168  ;;  %p20_p7 = scmp.ge.s32.totalorder %s1340_s15, 4   ;;  %s1551_s30 = smov %s1245_s10 }
 0x3cb   : > { %s1552_s10 = smov %s1249_s11  ;;  %s1553_s11 = smov %s1351_s18 }
 0x3cc   : > { %s1554_s12 = smov %s1340_s15  ;;  %22 = sbr.rel (!%p20_p7) target bundleno = 4 (0x4), region = 96 }
 0x3d3   :  { %881 = vsyncpa [#allocation3], 1 }
 0x3d4   :  { %883 = vsyncpa [#allocation3 + $0x1], 1 }
 0x3d5   :  { %884 = vsyncpa [#allocation4], 1 }
 0x3d6   :  { %886 = vsyncpa [#allocation4 + $0x1], 1 }

</bundles_post_ra>
